<compile_context>
chip_gen: v5e
topology: v5e:2x2
jax: 0.10.0
libtpu: 0.0.40
codegen_flags: <defaults>
</compile_context>

<pallas_src>
import functools

import jax
import jax.numpy as jnp
from jax.experimental import pallas as pl
from jax.experimental.pallas import tpu as pltpu


# ---------------------------------------------------------------------------
# Chip-aware VMEM budgeting
# ---------------------------------------------------------------------------
def _vmem_capacity_bytes():
    try:
        return int(pltpu.get_tpu_info().vmem_capacity_bytes)
    except Exception:
        return 64 << 20   # conservative: v7x per-core VMEM


def _conv_vmem_est(R, Wp, cin_t, cout_t, use_fold):
    """Rough per-grid-step VMEM footprint (bytes) for the 3x3 conv kernel."""
    M_t = R * Wp
    L_t = (R + 3) * Wp
    x_blk = L_t * cin_t * 2                    # bf16 input block
    w_blk = 9 * cin_t * cout_t * 2             # bf16 weight block
    o_blk = M_t * cout_t * 2                   # bf16 output block
    acc = M_t * cout_t * 4                     # f32 accumulator / partial
    if use_fold:
        tmp = M_t * 9 * cin_t * 2 + 2 * M_t * cin_t * 2   # lane-concat + shifts
    else:
        tmp = 3 * M_t * cin_t * 2                          # tap-shift copies
    return 2 * (x_blk + w_blk + o_blk) + acc + tmp + (2 << 20)


# ---------------------------------------------------------------------------
# 3x3 "same" conv (+bias, optional ReLU), bf16 out, f32 accumulation
# ---------------------------------------------------------------------------
def _conv3x3_kernel(x_ref, w_ref, b_ref, o_ref, *acc_refs,
                    Wp, M_t, n_cin, relu, use_fold):
    """One (batch n, row-tile t, cout-tile, cin-tile) grid step.

    x_ref: ((R+3)*Wp, cin_t) bf16  -- flattened padded row-tile (with halo)
    w_ref: (9, cin_t, cout_t) bf16
    b_ref: (1, cout_t) f32
    o_ref: (M_t, cout_t) bf16, M_t = R*Wp (cols >= W are garbage, dropped)
    acc_refs: optional ((M_t, cout_t) f32) scratch, only when n_cin > 1.
    Grid: (N, n_rt, n_cout, n_cin); o_ref resident across the cin axis.
    """
    cin_t = x_ref.shape[-1]
    cout_t = w_ref.shape[-1]

    # The 9 taps of a 3x3 same-conv are row-offset views of the flattened
    # padded tile: tap (dy, dx) starts at flat row dy*Wp + dx.  dy*Wp is
    # sublane-aligned because Wp % 8 == 0.
    taps = [x_ref[pl.ds(dy * Wp + dx, M_t), :]
            for dy in range(3) for dx in range(3)]

    if use_fold:
        # Lane-aligned (cin_t % 128 == 0) big-K fold: one long MXU push.
        p = jnp.concatenate(taps, axis=-1)                 # (M_t, 9*cin_t)
        wf = w_ref[...].reshape(9 * cin_t, cout_t)
        part = jnp.dot(p, wf, preferred_element_type=jnp.float32)
    elif cin_t == 1:
        # Tiny-Cin (first conv): pure-VPU broadcast FMA, no degenerate MXU dots.
        part = taps[0].astype(jnp.float32) * w_ref[0].astype(jnp.float32)
        for t in range(1, 9):
            part = part + taps[t].astype(jnp.float32) * w_ref[t].astype(jnp.float32)
    else:
        # Per-tap MXU dots accumulated in f32 (no 9x concat temp in VMEM).
        part = jnp.dot(taps[0], w_ref[0], preferred_element_type=jnp.float32)
        for t in range(1, 9):
            part = part + jnp.dot(taps[t], w_ref[t],
                                  preferred_element_type=jnp.float32)

    def epilogue(r):
        r = r + b_ref[...]
        if relu:
            r = jnp.maximum(r, 0.0)
        return r.astype(o_ref.dtype)

    if n_cin == 1:
        o_ref[...] = epilogue(part)
    else:
        acc_ref = acc_refs[0]
        ci = pl.program_id(3)

        @pl.when(ci == 0)
        def _():
            acc_ref[...] = part

        @pl.when(jnp.logical_and(ci > 0, ci < n_cin - 1))
        def _():
            acc_ref[...] += part

        @pl.when(ci == n_cin - 1)
        def _():
            # Merge final accumulate with the epilogue (single pass).
            o_ref[...] = epilogue(acc_ref[...] + part)


def conv2d_3x3_pallas(x, w, b, *, relu=True, row_tile=None):
    """3x3 conv, stride 1, padding 1, + bias (+ReLU).

    x: (N, H, W, Cin) f32/bf16; w: (3, 3, Cin, Cout); b: (Cout,).
    Returns (N, H, W, Cout) bf16.
    """
    N, H, W, Cin = x.shape
    Cout = w.shape[-1]

    Wp = ((W + 2 + 7) // 8) * 8          # padded width, multiple of 8
    Hp = H + 3                           # pad height by (1, 2)

    cin_t = min(Cin, 256)
    if Cin % cin_t:
        cin_t = Cin
    cout_t = min(Cout, 512)
    if Cout % cout_t:
        cout_t = Cout
    n_cin = Cin // cin_t
    n_cout = Cout // cout_t

    cap = _vmem_capacity_bytes()
    # Fold only when taps land on 128-lane boundaries and VMEM is plentiful
    # (v5e/v6e, 128 MiB).  On v7x (64 MiB) use per-tap dots (MRB accumulates
    # in place, and the 9x concat temp would not fit).
    use_fold = (cin_t % 128 == 0) and (cap > (96 << 20))
    budget = max(cap // 2, 24 << 20)
    vmem_limit = int(max(cap - (12 << 20), 32 << 20))

    # Pick the spatial row tile: largest divisor of H that fits the budget.
    if row_tile is not None:
        assert H % row_tile == 0
        R = row_tile
    else:
        max_R = H
        if N * n_cout == 1 and H % 2 == 0:
            max_R = H // 2       # guarantee a >=2 parallel axis (v7x megacore)
        R = 1
        for cand in range(max_R, 0, -1):
            if H % cand:
                continue
            if _conv_vmem_est(cand, Wp, cin_t, cout_t, use_fold) <= budget:
                R = cand
                break
    n_rt = H // R
    M_t = R * Wp
    L_t = (R + 3) * Wp

    # Host-side pad + row-tiling with duplicated halo rows (small: ~3/R extra).
    xp = jnp.pad(x.astype(jnp.bfloat16),
                 ((0, 0), (1, Hp - H - 1), (1, Wp - W - 1), (0, 0)))
    if n_rt == 1:
        x_tiled = xp.reshape(N, 1, Hp * Wp, Cin)
    else:
        x_tiled = jnp.stack([xp[:, t * R: t * R + R + 3] for t in range(n_rt)],
                            axis=1)
        x_tiled = x_tiled.reshape(N, n_rt, L_t, Cin)

    w9 = w.reshape(9, Cin, Cout).astype(jnp.bfloat16)
    b2 = b.reshape(1, Cout).astype(jnp.float32)

    scratch = [] if n_cin == 1 else [pltpu.VMEM((M_t, cout_t), jnp.float32)]

    out = pl.pallas_call(
        functools.partial(_conv3x3_kernel, Wp=Wp, M_t=M_t, n_cin=n_cin,
                          relu=relu, use_fold=use_fold),
        out_shape=jax.ShapeDtypeStruct((N, n_rt, M_t, Cout), jnp.bfloat16),
        grid_spec=pltpu.PrefetchScalarGridSpec(
            num_scalar_prefetch=0,
            grid=(N, n_rt, n_cout, n_cin),
            in_specs=[
                pl.BlockSpec((None, None, L_t, cin_t),
                             lambda n, t, co, ci: (n, t, 0, ci)),
                pl.BlockSpec((9, cin_t, cout_t),
                             lambda n, t, co, ci: (0, ci, co)),
                pl.BlockSpec((1, cout_t),
                             lambda n, t, co, ci: (0, co)),
            ],
            out_specs=pl.BlockSpec((None, None, M_t, cout_t),
                                   lambda n, t, co, ci: (n, t, 0, co)),
            scratch_shapes=scratch,
        ),
        compiler_params=pltpu.CompilerParams(
            dimension_semantics=("parallel", "parallel", "parallel", "arbitrary"),
            vmem_limit_bytes=vmem_limit),
    )(x_tiled, w9, b2)

    # (N, n_rt, R*Wp, Cout) -> (N, H, Wp, Cout), drop the garbage columns.
    return out.reshape(N, H, Wp, Cout)[:, :, :W, :]


# ---------------------------------------------------------------------------
# 1x1 conv (+bias), small Cout: VPU multiply + lane reduction, f32 out
# ---------------------------------------------------------------------------
def _conv1x1_kernel(x_ref, w_ref, b_ref, o_ref, *, cout):
    x = x_ref[...].astype(jnp.float32)                       # (pix_t, Cin)
    cols = []
    for c in range(cout):
        y = jnp.sum(x * w_ref[pl.ds(c, 1), :], axis=-1, keepdims=True)
        cols.append(y + b_ref[:, pl.ds(c, 1)])
    res = cols[0] if cout == 1 else jnp.concatenate(cols, axis=-1)
    o_ref[...] = res.astype(o_ref.dtype)


def conv2d_1x1_pallas(x, w, b):
    """1x1 conv + bias.  x: (N,H,W,Cin); w: (1,1,Cin,Cout).  Returns f32."""
    N, H, W, Cin = x.shape
    Cout = w.shape[-1]
    HW = H * W

    pix_t = HW
    while pix_t > 8192 and pix_t % 2 == 0:
        pix_t //= 2
    if pix_t != HW and pix_t % 8 != 0:
        pix_t = HW
    n_pix = HW // pix_t

    xf = x.reshape(N, HW, Cin).astype(jnp.bfloat16)
    wf = jnp.transpose(w.reshape(Cin, Cout)).astype(jnp.float32)   # (Cout, Cin)
    bf = b.reshape(1, Cout).astype(jnp.float32)

    cap = _vmem_capacity_bytes()
    vmem_limit = int(max(cap - (12 << 20), 32 << 20))

    out = pl.pallas_call(
        functools.partial(_conv1x1_kernel, cout=Cout),
        out_shape=jax.ShapeDtypeStruct((N, HW, Cout), jnp.float32),
        grid_spec=pltpu.PrefetchScalarGridSpec(
            num_scalar_prefetch=0,
            grid=(N, n_pix),
            in_specs=[
                pl.BlockSpec((None, pix_t, Cin), lambda n, p: (n, p, 0)),
                pl.BlockSpec((Cout, Cin), lambda n, p: (0, 0)),
                pl.BlockSpec((1, Cout), lambda n, p: (0, 0)),
            ],
            out_specs=pl.BlockSpec((None, pix_t, Cout), lambda n, p: (n, p, 0)),
        ),
        compiler_params=pltpu.CompilerParams(
            dimension_semantics=("parallel", "parallel"),
            vmem_limit_bytes=vmem_limit),
    )(xf, wf, bf)
    return out.reshape(N, H, W, Cout)


# ---------------------------------------------------------------------------
# Pool / upsample glue (plain JAX)
# ---------------------------------------------------------------------------
def maxpool2(x):
    # TODO(synk): fuse the 2x2 max-pool into the preceding conv's epilogue.
    N, H, W, C = x.shape
    return x.reshape(N, H // 2, 2, W // 2, 2, C).max(axis=(2, 4))


def upsample2(x):
    # nn.Upsample(scale_factor=2), default mode='nearest'
    return jnp.repeat(jnp.repeat(x, 2, axis=1), 2, axis=2)


# ---------------------------------------------------------------------------
# UNet wiring
# ---------------------------------------------------------------------------
_CFG = [
    ("conv1", 1, 64), ("conv2", 64, 128), ("conv3", 128, 256),
    ("conv4", 256, 512), ("conv5", 512, 1024), ("conv6", 1024, 512),
    ("conv7", 512, 256), ("conv8", 256, 128), ("conv9", 128, 64),
]


def init_params(key):
    """Deterministic He-normal weights, zero biases (shapes match nn.Module)."""
    params = {}
    for name, cin, cout in _CFG:
        key, k1, k2 = jax.random.split(key, 3)
        s1 = (2.0 / (9 * cin)) ** 0.5
        s2 = (2.0 / (9 * cout)) ** 0.5
        params[name] = (
            (s1 * jax.random.normal(k1, (3, 3, cin, cout), jnp.float32),
             jnp.zeros((cout,), jnp.float32)),
            (s2 * jax.random.normal(k2, (3, 3, cout, cout), jnp.float32),
             jnp.zeros((cout,), jnp.float32)),
        )
    key, k = jax.random.split(key)
    params["outconv"] = (
        (2.0 / 64) ** 0.5 * jax.random.normal(k, (1, 1, 64, 1), jnp.float32),
        jnp.zeros((1,), jnp.float32),
    )
    return params


def double_conv(x, p):
    (w1, b1), (w2, b2) = p
    x = conv2d_3x3_pallas(x, w1, b1, relu=True)
    x = conv2d_3x3_pallas(x, w2, b2, relu=True)
    return x


def unet_forward(x_nchw, params):
    x = jnp.transpose(x_nchw, (0, 2, 3, 1))        # NCHW -> NHWC
    x = double_conv(x, params["conv1"]); x = maxpool2(x)
    x = double_conv(x, params["conv2"]); x = maxpool2(x)
    x = double_conv(x, params["conv3"]); x = maxpool2(x)
    x = double_conv(x, params["conv4"]); x = maxpool2(x)
    x = double_conv(x, params["conv5"])
    x = upsample2(x); x = double_conv(x, params["conv6"])
    x = upsample2(x); x = double_conv(x, params["conv7"])
    x = upsample2(x); x = double_conv(x, params["conv8"])
    x = upsample2(x); x = double_conv(x, params["conv9"])
    wo, bo = params["outconv"]
    x = conv2d_1x1_pallas(x, wo, bo)               # 1x1 out conv, no ReLU
    return jnp.transpose(x, (0, 3, 1, 2))          # NHWC -> NCHW


# ---------------------------------------------------------------------------
# Reference (for self-check of the Pallas conv)
# ---------------------------------------------------------------------------
def _conv3x3_ref(x, w, b, relu):
    xb = x.astype(jnp.bfloat16).astype(jnp.float32)
    wb = w.astype(jnp.bfloat16).astype(jnp.float32)
    y = jax.lax.conv_general_dilated(
        xb, wb, window_strides=(1, 1), padding="SAME",
        dimension_numbers=("NHWC", "HWIO", "NHWC"),
        precision=jax.lax.Precision.HIGHEST) + b
    return jnp.maximum(y, 0.0) if relu else y


if __name__ == "__main__":
    key = jax.random.PRNGKey(0)
    kx, kp, k1, k2, k3, k4 = jax.random.split(key, 6)

    # Self-check 1: Cin=64, forced row-tiling (n_rt=4, halo duplication).
    xa = jax.random.normal(k1, (2, 16, 16, 64), jnp.float32)
    wa = 0.1 * jax.random.normal(k2, (3, 3, 64, 64), jnp.float32)
    ba = 0.1 * jax.random.normal(k3, (64,), jnp.float32)
    got = conv2d_3x3_pallas(xa, wa, ba, relu=True, row_tile=4).astype(jnp.float32)
    ref = _conv3x3_ref(xa, wa, ba, relu=True)
    assert bool(jnp.allclose(got, ref, atol=2e-2, rtol=2e-2)), "tiled conv mismatch"

    # Self-check 2: Cin=1 (pure-VPU broadcast) path.
    x1 = xa[..., :1]
    w1 = 0.3 * jax.random.normal(k2, (3, 3, 1, 64), jnp.float32)
    got = conv2d_3x3_pallas(x1, w1, ba, relu=True).astype(jnp.float32)
    ref = _conv3x3_ref(x1, w1, ba, relu=True)
    assert bool(jnp.allclose(got, ref, atol=2e-2, rtol=2e-2)), "Cin=1 conv mismatch"

    # Self-check 3: multi cin-tile accumulation (fold path on v5e/v6e).
    xc = jax.random.normal(k4, (1, 4, 4, 512), jnp.float32)
    wc = 0.05 * jax.random.normal(k2, (3, 3, 512, 256), jnp.float32)
    bc = 0.1 * jax.random.normal(k3, (256,), jnp.float32)
    got = conv2d_3x3_pallas(xc, wc, bc, relu=True).astype(jnp.float32)
    ref = _conv3x3_ref(xc, wc, bc, relu=True)
    assert bool(jnp.allclose(got, ref, atol=2e-2, rtol=2e-2)), "multi-cin mismatch"

    # Full UNet forward. Input matches the module's first conv (1 channel);
    # spatial must be divisible by 16 (four 2x2 pools).
    x = jax.random.normal(kx, (2, 1, 16, 16), dtype=jnp.float32)
    params = init_params(kp)
    fwd = jax.jit(unet_forward)
    y = jax.block_until_ready(fwd(x, params))
    assert y.shape == (2, 1, 16, 16) and y.dtype == jnp.float32
    print("KERNEL_OK")
</pallas_src>

<mosaic_0001>
module attributes {stable_mosaic.version = 11 : i64} {
  func.func @_conv3x3_kernel(%arg0: i32, %arg1: i32, %arg2: i32, %arg3: i32, %arg4: memref<1x1x168x64xbf16, #tpu.memory_space<vmem>>, %arg5: memref<9x64x64xbf16, #tpu.memory_space<vmem>>, %arg6: memref<1x64xf32, #tpu.memory_space<vmem>>, %arg7: memref<1x1x96x64xbf16, #tpu.memory_space<vmem>>) attributes {dimension_semantics = [#tpu.dimension_semantics<parallel>, #tpu.dimension_semantics<parallel>, #tpu.dimension_semantics<parallel>, #tpu.dimension_semantics<arbitrary>], iteration_bounds = array<i64: 2, 4, 1, 1>, scalar_prefetch = 0 : i64, scratch_operands = 0 : i64, tpu.core_type = #tpu.core_type<tc>, window_params = [{transform_indices = @transform_0, window_bounds = array<i64: 1, 1, 168, 64>}, {transform_indices = @transform_1, window_bounds = array<i64: 9, 64, 64>}, {transform_indices = @transform_2, window_bounds = array<i64: 1, 64>}, {transform_indices = @transform_3, window_bounds = array<i64: 1, 1, 96, 64>}]} {
    %c0 = arith.constant 0 : index
    %c0_0 = arith.constant 0 : index
    %c0_1 = arith.constant 0 : index
    %c0_2 = arith.constant 0 : index
    %0 = vector.load %arg4[%c0, %c0_0, %c0_1, %c0_2] : memref<1x1x168x64xbf16, #tpu.memory_space<vmem>>, vector<1x1x96x64xbf16>
    %1 = vector.shape_cast %0 : vector<1x1x96x64xbf16> to vector<96x64xbf16>
    %c0_3 = arith.constant 0 : index
    %c0_4 = arith.constant 0 : index
    %c1 = arith.constant 1 : index
    %c0_5 = arith.constant 0 : index
    %2 = vector.load %arg4[%c0_3, %c0_4, %c1, %c0_5] : memref<1x1x168x64xbf16, #tpu.memory_space<vmem>>, vector<1x1x96x64xbf16>
    %3 = vector.shape_cast %2 : vector<1x1x96x64xbf16> to vector<96x64xbf16>
    %c0_6 = arith.constant 0 : index
    %c0_7 = arith.constant 0 : index
    %c2 = arith.constant 2 : index
    %c0_8 = arith.constant 0 : index
    %4 = vector.load %arg4[%c0_6, %c0_7, %c2, %c0_8] : memref<1x1x168x64xbf16, #tpu.memory_space<vmem>>, vector<1x1x96x64xbf16>
    %5 = vector.shape_cast %4 : vector<1x1x96x64xbf16> to vector<96x64xbf16>
    %c0_9 = arith.constant 0 : index
    %c0_10 = arith.constant 0 : index
    %c24 = arith.constant 24 : index
    %c0_11 = arith.constant 0 : index
    %6 = vector.load %arg4[%c0_9, %c0_10, %c24, %c0_11] : memref<1x1x168x64xbf16, #tpu.memory_space<vmem>>, vector<1x1x96x64xbf16>
    %7 = vector.shape_cast %6 : vector<1x1x96x64xbf16> to vector<96x64xbf16>
    %c0_12 = arith.constant 0 : index
    %c0_13 = arith.constant 0 : index
    %c25 = arith.constant 25 : index
    %c0_14 = arith.constant 0 : index
    %8 = vector.load %arg4[%c0_12, %c0_13, %c25, %c0_14] : memref<1x1x168x64xbf16, #tpu.memory_space<vmem>>, vector<1x1x96x64xbf16>
    %9 = vector.shape_cast %8 : vector<1x1x96x64xbf16> to vector<96x64xbf16>
    %c0_15 = arith.constant 0 : index
    %c0_16 = arith.constant 0 : index
    %c26 = arith.constant 26 : index
    %c0_17 = arith.constant 0 : index
    %10 = vector.load %arg4[%c0_15, %c0_16, %c26, %c0_17] : memref<1x1x168x64xbf16, #tpu.memory_space<vmem>>, vector<1x1x96x64xbf16>
    %11 = vector.shape_cast %10 : vector<1x1x96x64xbf16> to vector<96x64xbf16>
    %c0_18 = arith.constant 0 : index
    %c0_19 = arith.constant 0 : index
    %c48 = arith.constant 48 : index
    %c0_20 = arith.constant 0 : index
    %12 = vector.load %arg4[%c0_18, %c0_19, %c48, %c0_20] : memref<1x1x168x64xbf16, #tpu.memory_space<vmem>>, vector<1x1x96x64xbf16>
    %13 = vector.shape_cast %12 : vector<1x1x96x64xbf16> to vector<96x64xbf16>
    %c0_21 = arith.constant 0 : index
    %c0_22 = arith.constant 0 : index
    %c49 = arith.constant 49 : index
    %c0_23 = arith.constant 0 : index
    %14 = vector.load %arg4[%c0_21, %c0_22, %c49, %c0_23] : memref<1x1x168x64xbf16, #tpu.memory_space<vmem>>, vector<1x1x96x64xbf16>
    %15 = vector.shape_cast %14 : vector<1x1x96x64xbf16> to vector<96x64xbf16>
    %c0_24 = arith.constant 0 : index
    %c0_25 = arith.constant 0 : index
    %c50 = arith.constant 50 : index
    %c0_26 = arith.constant 0 : index
    %16 = vector.load %arg4[%c0_24, %c0_25, %c50, %c0_26] : memref<1x1x168x64xbf16, #tpu.memory_space<vmem>>, vector<1x1x96x64xbf16>
    %17 = vector.shape_cast %16 : vector<1x1x96x64xbf16> to vector<96x64xbf16>
    %c0_27 = arith.constant 0 : index
    %c0_28 = arith.constant 0 : index
    %c0_29 = arith.constant 0 : index
    %18 = vector.load %arg5[%c0_27, %c0_28, %c0_29] : memref<9x64x64xbf16, #tpu.memory_space<vmem>>, vector<1x64x64xbf16>
    %19 = vector.shape_cast %18 : vector<1x64x64xbf16> to vector<64x64xbf16>
    %cst = arith.constant dense<0.000000e+00> : vector<96x64xf32>
    %20 = tpu.matmul %1, %19, %cst {dimension_numbers = #tpu.dot_dimension_numbers<[1], [0], [0], [1], [0, 0, 1, 1], [], []>} : vector<96x64xbf16>, vector<64x64xbf16>, vector<96x64xf32> -> vector<96x64xf32>
    %c1_30 = arith.constant 1 : index
    %c0_31 = arith.constant 0 : index
    %c0_32 = arith.constant 0 : index
    %21 = vector.load %arg5[%c1_30, %c0_31, %c0_32] : memref<9x64x64xbf16, #tpu.memory_space<vmem>>, vector<1x64x64xbf16>
    %22 = vector.shape_cast %21 : vector<1x64x64xbf16> to vector<64x64xbf16>
    %cst_33 = arith.constant dense<0.000000e+00> : vector<96x64xf32>
    %23 = tpu.matmul %3, %22, %cst_33 {dimension_numbers = #tpu.dot_dimension_numbers<[1], [0], [0], [1], [0, 0, 1, 1], [], []>} : vector<96x64xbf16>, vector<64x64xbf16>, vector<96x64xf32> -> vector<96x64xf32>
    %24 = arith.addf %20, %23 : vector<96x64xf32>
    %c2_34 = arith.constant 2 : index
    %c0_35 = arith.constant 0 : index
    %c0_36 = arith.constant 0 : index
    %25 = vector.load %arg5[%c2_34, %c0_35, %c0_36] : memref<9x64x64xbf16, #tpu.memory_space<vmem>>, vector<1x64x64xbf16>
    %26 = vector.shape_cast %25 : vector<1x64x64xbf16> to vector<64x64xbf16>
    %cst_37 = arith.constant dense<0.000000e+00> : vector<96x64xf32>
    %27 = tpu.matmul %5, %26, %cst_37 {dimension_numbers = #tpu.dot_dimension_numbers<[1], [0], [0], [1], [0, 0, 1, 1], [], []>} : vector<96x64xbf16>, vector<64x64xbf16>, vector<96x64xf32> -> vector<96x64xf32>
    %28 = arith.addf %24, %27 : vector<96x64xf32>
    %c3 = arith.constant 3 : index
    %c0_38 = arith.constant 0 : index
    %c0_39 = arith.constant 0 : index
    %29 = vector.load %arg5[%c3, %c0_38, %c0_39] : memref<9x64x64xbf16, #tpu.memory_space<vmem>>, vector<1x64x64xbf16>
    %30 = vector.shape_cast %29 : vector<1x64x64xbf16> to vector<64x64xbf16>
    %cst_40 = arith.constant dense<0.000000e+00> : vector<96x64xf32>
    %31 = tpu.matmul %7, %30, %cst_40 {dimension_numbers = #tpu.dot_dimension_numbers<[1], [0], [0], [1], [0, 0, 1, 1], [], []>} : vector<96x64xbf16>, vector<64x64xbf16>, vector<96x64xf32> -> vector<96x64xf32>
    %32 = arith.addf %28, %31 : vector<96x64xf32>
    %c4 = arith.constant 4 : index
    %c0_41 = arith.constant 0 : index
    %c0_42 = arith.constant 0 : index
    %33 = vector.load %arg5[%c4, %c0_41, %c0_42] : memref<9x64x64xbf16, #tpu.memory_space<vmem>>, vector<1x64x64xbf16>
    %34 = vector.shape_cast %33 : vector<1x64x64xbf16> to vector<64x64xbf16>
    %cst_43 = arith.constant dense<0.000000e+00> : vector<96x64xf32>
    %35 = tpu.matmul %9, %34, %cst_43 {dimension_numbers = #tpu.dot_dimension_numbers<[1], [0], [0], [1], [0, 0, 1, 1], [], []>} : vector<96x64xbf16>, vector<64x64xbf16>, vector<96x64xf32> -> vector<96x64xf32>
    %36 = arith.addf %32, %35 : vector<96x64xf32>
    %c5 = arith.constant 5 : index
    %c0_44 = arith.constant 0 : index
    %c0_45 = arith.constant 0 : index
    %37 = vector.load %arg5[%c5, %c0_44, %c0_45] : memref<9x64x64xbf16, #tpu.memory_space<vmem>>, vector<1x64x64xbf16>
    %38 = vector.shape_cast %37 : vector<1x64x64xbf16> to vector<64x64xbf16>
    %cst_46 = arith.constant dense<0.000000e+00> : vector<96x64xf32>
    %39 = tpu.matmul %11, %38, %cst_46 {dimension_numbers = #tpu.dot_dimension_numbers<[1], [0], [0], [1], [0, 0, 1, 1], [], []>} : vector<96x64xbf16>, vector<64x64xbf16>, vector<96x64xf32> -> vector<96x64xf32>
    %40 = arith.addf %36, %39 : vector<96x64xf32>
    %c6 = arith.constant 6 : index
    %c0_47 = arith.constant 0 : index
    %c0_48 = arith.constant 0 : index
    %41 = vector.load %arg5[%c6, %c0_47, %c0_48] : memref<9x64x64xbf16, #tpu.memory_space<vmem>>, vector<1x64x64xbf16>
    %42 = vector.shape_cast %41 : vector<1x64x64xbf16> to vector<64x64xbf16>
    %cst_49 = arith.constant dense<0.000000e+00> : vector<96x64xf32>
    %43 = tpu.matmul %13, %42, %cst_49 {dimension_numbers = #tpu.dot_dimension_numbers<[1], [0], [0], [1], [0, 0, 1, 1], [], []>} : vector<96x64xbf16>, vector<64x64xbf16>, vector<96x64xf32> -> vector<96x64xf32>
    %44 = arith.addf %40, %43 : vector<96x64xf32>
    %c7 = arith.constant 7 : index
    %c0_50 = arith.constant 0 : index
    %c0_51 = arith.constant 0 : index
    %45 = vector.load %arg5[%c7, %c0_50, %c0_51] : memref<9x64x64xbf16, #tpu.memory_space<vmem>>, vector<1x64x64xbf16>
    %46 = vector.shape_cast %45 : vector<1x64x64xbf16> to vector<64x64xbf16>
    %cst_52 = arith.constant dense<0.000000e+00> : vector<96x64xf32>
    %47 = tpu.matmul %15, %46, %cst_52 {dimension_numbers = #tpu.dot_dimension_numbers<[1], [0], [0], [1], [0, 0, 1, 1], [], []>} : vector<96x64xbf16>, vector<64x64xbf16>, vector<96x64xf32> -> vector<96x64xf32>
    %48 = arith.addf %44, %47 : vector<96x64xf32>
    %c8 = arith.constant 8 : index
    %c0_53 = arith.constant 0 : index
    %c0_54 = arith.constant 0 : index
    %49 = vector.load %arg5[%c8, %c0_53, %c0_54] : memref<9x64x64xbf16, #tpu.memory_space<vmem>>, vector<1x64x64xbf16>
    %50 = vector.shape_cast %49 : vector<1x64x64xbf16> to vector<64x64xbf16>
    %cst_55 = arith.constant dense<0.000000e+00> : vector<96x64xf32>
    %51 = tpu.matmul %17, %50, %cst_55 {dimension_numbers = #tpu.dot_dimension_numbers<[1], [0], [0], [1], [0, 0, 1, 1], [], []>} : vector<96x64xbf16>, vector<64x64xbf16>, vector<96x64xf32> -> vector<96x64xf32>
    %52 = arith.addf %48, %51 : vector<96x64xf32>
    %c0_56 = arith.constant 0 : index
    %c0_57 = arith.constant 0 : index
    %53 = vector.load %arg6[%c0_56, %c0_57] : memref<1x64xf32, #tpu.memory_space<vmem>>, vector<1x64xf32>
    %54 = vector.broadcast %53 : vector<1x64xf32> to vector<96x64xf32>
    %55 = arith.addf %52, %54 : vector<96x64xf32>
    %cst_58 = arith.constant 0.000000e+00 : f32
    %56 = vector.broadcast %cst_58 : f32 to vector<96x64xf32>
    %57 = arith.maximumf %55, %56 : vector<96x64xf32>
    %58 = arith.truncf %57 : vector<96x64xf32> to vector<96x64xbf16>
    %c0_59 = arith.constant 0 : index
    %c0_60 = arith.constant 0 : index
    %c0_61 = arith.constant 0 : index
    %c0_62 = arith.constant 0 : index
    %59 = vector.load %arg7[%c0_59, %c0_60, %c0_61, %c0_62] : memref<1x1x96x64xbf16, #tpu.memory_space<vmem>>, vector<1x1x96x64xbf16>
    %60 = vector.shape_cast %59 : vector<1x1x96x64xbf16> to vector<96x64xbf16>
    %61 = vector.shape_cast %58 : vector<96x64xbf16> to vector<1x1x96x64xbf16>
    tpu.vector_store %arg7[%c0_59, %c0_60, %c0_61, %c0_62], %61 {strides = array<i32>} : memref<1x1x96x64xbf16, #tpu.memory_space<vmem>>, vector<1x1x96x64xbf16>,
    return
  }
  func.func @transform_0(%arg0: i32, %arg1: i32, %arg2: i32, %arg3: i32) -> (i32, i32, i32, i32) {
    %c0_i32 = arith.constant 0 : i32
    %c0_i32_0 = arith.constant 0 : i32
    return %arg0, %arg1, %c0_i32, %arg3 : i32, i32, i32, i32
  }
  func.func @transform_1(%arg0: i32, %arg1: i32, %arg2: i32, %arg3: i32) -> (i32, i32, i32) {
    %c0_i32 = arith.constant 0 : i32
    %c0_i32_0 = arith.constant 0 : i32
    return %c0_i32, %arg3, %arg2 : i32, i32, i32
  }
  func.func @transform_2(%arg0: i32, %arg1: i32, %arg2: i32, %arg3: i32) -> (i32, i32) {
    %c0_i32 = arith.constant 0 : i32
    %c0_i32_0 = arith.constant 0 : i32
    return %c0_i32, %arg2 : i32, i32
  }
  func.func @transform_3(%arg0: i32, %arg1: i32, %arg2: i32, %arg3: i32) -> (i32, i32, i32, i32) {
    %c0_i32 = arith.constant 0 : i32
    %c0_i32_0 = arith.constant 0 : i32
    return %arg0, %arg1, %c0_i32, %arg2 : i32, i32, i32, i32
  }
}

</mosaic_0001>

<bundles_post_ra>
// kernel: tpu_custom_call.1
= control target key start
LH: loop header
LB: loop body
LE: loop exit
PB: predicated region body
PF: predicated region fallthrough
CT: control target
= control target key end

     0   :  { %s2112_s12 = smov 0   ;;  %s2114_s13 = smov 0   ;;  %s2627_s0 = inlined_call_operand.vmem [shape: bf16[2,4,168,64], index: 0, kind: input, shape index: {}]   ;;  %s2628_s1 = inlined_call_operand.vmem [shape: bf16[9,64,64], index: 1, kind: input, shape index: {}]   ;;  %s2629_s2 = inlined_call_operand.vmem [shape: f32[1,64], index: 2, kind: input, shape index: {}]   ;;  %s2630_s3 = inlined_call_operand.vmem [shape: bf16[2,4,96,64], index: 3, kind: output, shape index: {}]  }
   0x1   :  { %s2116_s14 = smov 0   ;;  %s2118_s15 = smov 0  }
   0x2   :  { %s2120_s16 = smov 0  }
   0x3 LB: > { %s35_s17 = sadd.s32 1, %s2082_s14  ;;  %s39_s18 = sadd.s32 1, %s2086_s15  ;;  %s2090_s16 = sphi %s2120_s16, %s13_s16   ;;  %s2086_s15 = sphi %s2118_s15, %s2634_s15   ;;  %s2082_s14 = sphi %s2116_s14, %s2633_s14   ;;  %s2078_s13 = sphi %s2114_s13, %s2632_s13   ;;  %s2074_s12 = sphi %s2112_s12, %s2631_s12  }
   0x4   : > { %p37_p0 = scmp.ge.s32.totalorder %s35_s17, 4  ;;  %p1617_p1 = scmp.ge.s32.totalorder %s2090_s16, 1 }
   0x5   : > { %p202_p2 = scmp.lt.s32.totalorder %s2090_s16, 9 }
   0x6   : > { %s2636_s17 = smov (%p37_p0, %s35_s17), 0  ;;  %s2638_s18 = smov (!%p37_p0, %s39_s18), %s2086_s15 }
   0x7   : > { %p203_p3 = pnand %p1617_p1, %p202_p2  ;;  %p41_p4 = scmp.ge.s32.totalorder %s2638_s18, 2 }
   0x8   : > { %p251_p5 = scmp.lt.s32.totalorder (!%p203_p3), %s2078_s13, 1  ;;  %p253_p6 = scmp.lt.s32.totalorder (!%p203_p3), %s2074_s12, 3 }
   0x9   : > { %s2640_s18 = smov (%p41_p4, %s2638_s18), 0  ;;  %206 = sbr.rel (%p203_p3) target bundleno = 391 (0x187), region = 32 }
   0xe   : > { %v1896_v0 = vld [vmem:[%s2628_s1 + $0x38] sm:$0xff]  ;;  %v1895_v1 = vld [vmem:[%s2628_s1 + $0x30] sm:$0xff]  ;;  %s2642_s13 = smov (!%p251_p5, %s2078_s13), 1  ;;  %s2644_s12 = smov (!%p253_p6, %s2074_s12), 3  ;;  %v1894_v2 = vld [vmem:[%s2628_s1 + $0x28] sm:$0xff]  ;;  %vm439_vm1 = vcmask 523264  }
   0xf   : > { %1991 = vmatpush.bf16.msra.mxu1 %v1896_v0  ;;  %1992 = vmatpush.bf16.msra.mxu2 %v1896_v0  ;;  %s2008_s23 = smul.u32 84, %s2642_s13  ;;  %v1893_v3 = vld [vmem:[%s2628_s1 + $0x20] sm:$0xff]  ;;  %v1900_v4 = vld [vmem:[%s2628_s1 + $0x58] sm:$0xff]  ;;  %vm362_vm0 = vsmask.f32 7424  ;;  %v1899_v31 = vld [vmem:[%s2628_s1 + $0x50] sm:$0xff] }
  0x10   : > { %1993 = vmatpush.bf16.msra.mxu3 %v1896_v0  ;;  %462 = vmatpush.bf16.msra.mxu0 %v1896_v0  ;;  %s2007_s24 = smul.u32 21, %s2644_s12  ;;  %v1892_v5 = vld [vmem:[%s2628_s1 + $0x18] sm:$0xff]  ;;  %v1891_v33 = vld [vmem:[%s2628_s1 + $0x10] sm:$0xff]  ;;  %v1898_v46 = vld [vmem:[%s2628_s1 + $0x48] sm:$0xff]  ;;  %vm584_vm2 = vcmask 1046528   ;;  %vm1453_vm3 = vcmask 519168  }
  0x11   : > { %v1904_v24 = vld [vmem:[%s2628_s1 + $0x78] sm:$0xff]  ;;  %v1903_v40 = vld [vmem:[%s2628_s1 + $0x70] sm:$0xff]  ;;  %v1890_v48 = vld [vmem:[%s2628_s1 + $0x8] sm:$0xff]  ;;  %s2010_s21 = smul.u32 48, %s2642_s13 }
  0x12   : > { %s260_s27 = sadd.s32 %s2008_s23, %s2007_s24  ;;  %v1908_v26 = vld [vmem:[%s2628_s1 + $0x98] sm:$0xff]  ;;  %v1907_v41 = vld [vmem:[%s2628_s1 + $0x90] sm:$0xff]  ;;  %v1902_v51 = vld [vmem:[%s2628_s1 + $0x68] sm:$0xff] }
  0x13   : > { %1994 = vmatpush.bf16.msra.mxu1 %v1895_v1  ;;  %1995 = vmatpush.bf16.msra.mxu2 %v1895_v1  ;;  %s1618_s28 = sshll.u32 %s260_s27, 2  ;;  %v1906_v52 = vld [vmem:[%s2628_s1 + $0x88] sm:$0xff]  ;;  %v1897_v56 = vld [vmem:[%s2628_s1 + $0x40] sm:$0xff]  ;;  %v1916_v58 = vld [vmem:[%s2628_s1 + $0xd8] sm:$0xff] }
  0x14   : > { %1996 = vmatpush.bf16.msra.mxu3 %v1895_v1  ;;  %463 = vmatpush.bf16.msra.mxu0 %v1895_v1  ;;  %s2163_s6 = scalar_lea.vmem %s2627_s0, %s1618_s28  ;;  %v1889_v57 = vld [vmem:[%s2628_s1] sm:$0xff]  ;;  %v1920_v63 = vld [vmem:[%s2628_s1 + $0xf8] sm:$0xff] }
  0x15   : > { %v2172_v6 = vld [vmem:[%s2163_s6 + $0x8] sm:$0xff]   ;;  %v2175_v7 = vld [vmem:[%s2163_s6 + $0x10] sm:$0xff]   ;;  %v2178_v8 = vld [vmem:[%s2163_s6 + $0x18] sm:$0xff]  }
  0x16   : > { %v371_v9 = vshll.u32 %v2172_v6, 16  ;;  %v375_v10 = vshrl.u32 %v2172_v6, 16  ;;  %v379_v11 = vshll.u32 %v2175_v7, 16  ;;  %v2184_v12 = vld [vmem:[%s2163_s6 + $0x20] sm:$0xff]   ;;  %v387_v13 = vshll.u32 %v2178_v8, 16  ;;  %v2188_v14 = vld [vmem:[%s2163_s6 + $0x28] sm:$0xff]  }
  0x17   : > { %1997 = vmatpush.bf16.msra.mxu1 %v1894_v2  ;;  %1998 = vmatpush.bf16.msra.mxu2 %v1894_v2  ;;  %v391_v15 = vshrl.u32 %v2178_v8, 16  ;;  %v395_v16 = vshll.u32 %v2184_v12, 16  ;;  %v300_v17 = vld [vmem:[%s2163_s6 + $0x30] sm:$0x1]  ;;  %v403_v18 = vshll.u32 %v2188_v14, 16  ;;  %v407_v19 = vshrl.u32 %v2188_v14, 16 }
  0x18   : > { %1999 = vmatpush.bf16.msra.mxu3 %v1894_v2  ;;  %464 = vmatpush.bf16.msra.mxu0 %v1894_v2  ;;  %v373_v20 = vrot.slane %v371_v9, 1  ;;  %v2195_v21 = vrot.slane %v379_v11, 1  ;;  %v2197_v22 = vrot.slane %v387_v13, 1  ;;  %v354_v23 = vunpack.c.l.b16 %v300_v17  ;;  %v2203_v25 = vld [vmem:[%s2163_s6] sm:$0xff]   ;;  %v2272_v59 = vld [vmem:[%s2163_s6 + $0x14] sm:$0xff]  }
  0x19   : > { %v397_v27 = vrot.slane %v395_v16, 1  ;;  %v2208_v28 = vrot.slane %v403_v18, 1  ;;  %v364_v35 = vshrl.u32 %v2203_v25, 16  ;;  %v366_v36 = vshll.u32 %v2203_v25, 16  ;;  %v1901_v61 = vld [vmem:[%s2628_s1 + $0x60] sm:$0xff]  ;;  %v1912_v0 = vld [vmem:[%s2628_s1 + $0xb8] sm:$0xff] }
  0x1a   : > { %v377_v29 = vor.u32 %v375_v10, %v373_v20  ;;  %v393_v30 = vor.u32 %v391_v15, %v2197_v22  ;;  %v2214_v32 = vpack.c.b16 %v354_v23, %v354_v23  ;;  %v1932_v42 = vunpack.c.h.b16 %v2172_v6  ;;  %v1905_v62 = vld [vmem:[%s2628_s1 + $0x80] sm:$0xff]  ;;  %v1915_v16 = vld [vmem:[%s2628_s1 + $0xd0] sm:$0xff] }
  0x1b   : > { %2000 = vmatpush.bf16.msra.mxu1 %v1893_v3  ;;  %2001 = vmatpush.bf16.msra.mxu2 %v1893_v3  ;;  %v2220_v34 = vor.u32 %v407_v19, %v2208_v28  ;;  %v368_v43 = vrot.slane %v366_v36, 1  ;;  %v1935_v44 = vunpack.c.l.b16 %v2175_v7  ;;  %v383_v54 = vshrl.u32 %v2175_v7, 16  ;;  %v1964_v17 = vld [vmem:[%s2163_s6] sm:$0xf0]  ;;  %v1965_v18 = vld [vmem:[%s2163_s6] sm:$0xe] }
  0x1c   : > { %2002 = vmatpush.bf16.msra.mxu3 %v1893_v3  ;;  %465 = vmatpush.bf16.msra.mxu0 %v1893_v3  ;;  %v382_v37 = vsel %vm362_vm0, %v377_v29, %v2195_v21  ;;  %v2227_v38 = vsel %vm362_vm0, %v393_v30, %v397_v27  ;;  %v411_v39 = vshll.u32 %v2214_v32, 16  ;;  %v399_v55 = vshrl.u32 %v2184_v12, 16  ;;  %v1924_v3 = vld [vmem:[%s2628_s1 + $0x118] sm:$0xff]  ;;  %v1911_v23 = vld [vmem:[%s2628_s1 + $0xb0] sm:$0xff] }
  0x1d   : > { %v369_v47 = vor.u32 %v368_v43, %v364_v35  ;;  %v706_v49 = vpack.c.b16 %v1935_v44, %v1932_v42  ;;  %v385_v1 = vor.u32 %v383_v54, %v2195_v21  ;;  %v823_v9 = vshll.u32 %v2272_v59, 16  ;;  %v1923_v36 = vld [vmem:[%s2628_s1 + $0x110] sm:$0xff] }
  0x1e   : > { %1645 = vmatmul.msk.bf16.vlgmr.msra.gmra.mxu1 %vm439_vm1, %v382_v37  ;;  %1647 = vmatmul.msk.bf16.vlgmr.msra.gmra.mxu2 %vm439_vm1, %v2227_v38  ;;  %v413_v45 = vrot.slane %v411_v39, 1  ;;  %v401_v2 = vor.u32 %v399_v55, %v397_v27  ;;  %v1943_v21 = vunpack.c.l.b16 %v2184_v12  ;;  %v827_v29 = vshrl.u32 %v2272_v59, 16  ;;  %v2335_v39 = vld [vmem:[%s2163_s6 + $0x24] sm:$0xff]  }
  0x1f   : > { %644 = vmatpush.bf16.msrb.mxu2 %v1900_v4  ;;  %537 = vmatpush.bf16.msrb.mxu1 %v1892_v5  ;;  %v374_v53 = vsel %vm362_vm0, %v369_v47, %v373_v20  ;;  %v819_v60 = vshll.u32 %v706_v49, 16  ;;  %v817_v4 = vshrl.u32 %v706_v49, 16  ;;  %v390_v10 = vsel %vm362_vm0, %v385_v1, %v2197_v22  ;;  %v1919_v22 = vld [vmem:[%s2628_s1 + $0xf0] sm:$0xff]  ;;  %v1918_v47 = vld [vmem:[%s2628_s1 + $0xe8] sm:$0xff] }
  0x20   : > { %758 = vmatpush.bf16.msrb.mxu3 %v1904_v24  ;;  %909 = vmatpush.bf16.msrb.mxu0 %v1908_v26  ;;  %v414_v50 = vsel %vm362_vm0, %v2220_v34, %v413_v45  ;;  %v2295_v11 = vsel %vm362_vm0, %v401_v2, %v2208_v28  ;;  %v825_v15 = vrot.slane %v823_v9, 1  ;;  %v1940_v20 = vunpack.c.h.b16 %v2178_v8  ;;  %v1921_v9 = vld [vmem:[%s2628_s1 + $0x100] sm:$0xff] }
  0x21   : > { %1649 = vmatmul.msk.bf16.vlgmr.msra.gmra.mxu3 %vm439_vm1, %v414_v50  ;;  %1644 = vmatmul.msk.bf16.vlgmr.msra.gmra.mxu0 %vm439_vm1, %v374_v53  ;;  %v821_v5 = vrot.slane %v819_v60, 1  ;;  %v1966_v24 = vor.u32 %v1965_v18, %v1964_v17  ;;  %v586_v28 = vrot.slane %v2172_v6, 1  ;;  %v2361_v50 = vld [vmem:[%s2163_s6 + $0x2c] sm:$0xff]   ;;  %v1917_v60 = vld [vmem:[%s2628_s1 + $0xe0] sm:$0xff] }
  0x22   : > { %v2318_v26 = vpack.c.b16 %v1943_v21, %v1940_v20  ;;  %v844_v53 = vshll.u32 %v2361_v50, 16 }
  0x23   : > { %645 = vmatpush.bf16.msrb.mxu2 %v1899_v31  ;;  %538 = vmatpush.bf16.msrb.mxu1 %v1891_v33  ;;  %v822_v13 = vor.u32 %v821_v5, %v817_v4  ;;  %v585_v27 = vrot.slane %v1966_v24, 1  ;;  %v829_v33 = vor.u32 %v827_v29, %v825_v15  ;;  %v305_v5 = vld [vmem:[%s2163_s6 + $0x3c] sm:$0x1]  ;;  %v311_v24 = vld [vmem:[%s2163_s6 + $0x18] sm:$0xe] }
  0x24   : > { %759 = vmatpush.bf16.msrb.mxu3 %v1903_v40  ;;  %910 = vmatpush.bf16.msrb.mxu0 %v1907_v41  ;;  %v830_v30 = vshll.u32 %v2318_v26, 16  ;;  %v588_v40 = vrot.slane %v2175_v7, 1  ;;  %v837_v41 = vshll.u32 %v2335_v39, 16 }
  0x25   : > { %v826_v19 = vsel %vm362_vm0, %v822_v13, %v825_v15  ;;  %v587_v31 = vsel %vm584_vm2, %v585_v27, %v586_v28  ;;  %v815_v13 = vunpack.c.l.b16 %v305_v5  ;;  %v1311_v27 = vunpack.c.l.b16 %v311_v24 }
  0x26   : > { %v832_v35 = vrot.slane %v830_v30, 1  ;;  %v589_v42 = vsel %vm584_vm2, %v586_v28, %v588_v40  ;;  %v839_v45 = vrot.slane %v837_v41, 1  ;;  %v596_v28 = vrot.slane %v2214_v32, 1 }
  0x27   : > { %646 = vmatpush.bf16.msrb.mxu2 %v1898_v46  ;;  %539 = vmatpush.bf16.msrb.mxu1 %v1890_v48  ;;  %v1914_v46 = vld [vmem:[%s2628_s1 + $0xc8] sm:$0xff]  ;;  %v2401_v15 = vpack.c.b16 %v815_v13, %v815_v13  ;;  %v1312_v29 = vpack.c.b16 %v1940_v20, %v1311_v27 }
  0x28   : > { %760 = vmatpush.bf16.msrb.mxu3 %v1902_v51  ;;  %911 = vmatpush.bf16.msrb.mxu0 %v1906_v52  ;;  %v833_v37 = vsel %vm362_vm0, %v829_v33, %v832_v35  ;;  %v1910_v48 = vld [vmem:[%s2628_s1 + $0xa8] sm:$0xff]  ;;  %v590_v51 = vrot.slane %v2178_v8, 1  ;;  %v841_v52 = vshrl.u32 %v2335_v39, 16 }
  0x29   : > { %v859_v18 = vshll.u32 %v2401_v15, 16  ;;  %v1313_v33 = vrot.slane %v1312_v29, 1 }
  0x2a   : > { %v591_v54 = vsel %vm584_vm2, %v588_v40, %v590_v51  ;;  %v843_v55 = vor.u32 %v841_v52, %v839_v45 }
  0x2b   : > { %647 = vmatpush.bf16.msrb.mxu2 %v1897_v56  ;;  %540 = vmatpush.bf16.msrb.mxu1 %v1889_v57  ;;  %v846_v56 = vrot.slane %v844_v53, 1  ;;  %v1913_v57 = vld [vmem:[%s2628_s1 + $0xc0] sm:$0xff] }
  0x2c   : > { %761 = vmatpush.bf16.msrb.mxu3 %v1901_v61  ;;  %912 = vmatpush.bf16.msrb.mxu0 %v1905_v62  ;;  %v1909_v61 = vld [vmem:[%s2628_s1 + $0xa0] sm:$0xff]  ;;  %v2384_v62 = vld [vmem:[%s2163_s6 + $0x34] sm:$0xff]  }
  0x2d   : > { %v851_v1 = vshll.u32 %v2384_v62, 16  ;;  %v855_v17 = vshrl.u32 %v2384_v62, 16 }
  0x2e   : > { %1646 = vmatmul.msk.bf16.gmra.mxu1 %vm439_vm1, %v390_v10  ;;  %1648 = vmatmul.msk.bf16.gmra.mxu2 %vm439_vm1, %v2295_v11 }
  0x2f   : > { %1129 = vmatpush.bf16.msra.mxu2 %v1916_v58  ;;  %1027 = vmatpush.bf16.msra.mxu1 %v1912_v0  ;;  %v847_v58 = vsel %vm362_vm0, %v843_v55, %v846_v56  ;;  %v848_v0 = vshrl.u32 %v2361_v50, 16  ;;  %v853_v4 = vrot.slane %v851_v1, 1 }
  0x30   : > { %1254 = vmatpush.bf16.msra.mxu3 %v1920_v63  ;;  %1366 = vmatpush.bf16.msra.mxu0 %v1924_v3  ;;  %v592_v63 = vrot.slane %v2184_v12, 1 }
  0x31   : > { %1726 = vmatmul.msk.bf16.vlgmr.msrb.gmra.mxu3 %vm439_vm1, %v706_v49  ;;  %1756 = vmatmul.msk.bf16.vlgmr.msrb.gmra.mxu0 %vm439_vm1, %v826_v19  ;;  %v850_v3 = vor.u32 %v848_v0, %v846_v56  ;;  %v857_v21 = vor.u32 %v855_v17, %v853_v4  ;;  %v973_v56 = vrot.slane %v2335_v39, 1 }
  0x32   : > { %v593_v2 = vsel %vm584_vm2, %v590_v51, %v592_v63 }
  0x33   : > { %1130 = vmatpush.bf16.msra.mxu2 %v1915_v16  ;;  %1028 = vmatpush.bf16.msra.mxu1 %v1911_v23  ;;  %v854_v10 = vsel %vm362_vm0, %v850_v3, %v853_v4  ;;  %v594_v16 = vrot.slane %v2188_v14, 1 }
  0x34   : > { %1255 = vmatpush.bf16.msra.mxu3 %v1919_v22  ;;  %1367 = vmatpush.bf16.msra.mxu0 %v1923_v36  ;;  %v861_v22 = vrot.slane %v859_v18, 1  ;;  %v1314_v36 = vsel %vm584_vm2, %v1313_v33, %v592_v63 }
  0x35   : > { %v595_v19 = vsel %vm584_vm2, %v592_v63, %v594_v16  ;;  %v597_v30 = vsel %vm584_vm2, %v594_v16, %v596_v28 }
  0x36   : > { %v862_v23 = vsel %vm362_vm0, %v857_v21, %v861_v22 }
  0x37   : > { %1131 = vmatpush.bf16.msra.mxu2 %v1914_v46  ;;  %1029 = vmatpush.bf16.msra.mxu1 %v1910_v48 }
  0x38   : > { %1256 = vmatpush.bf16.msra.mxu3 %v1918_v47 }
  0x3b   : > { %1132 = vmatpush.bf16.msra.mxu2 %v1913_v57  ;;  %1030 = vmatpush.bf16.msra.mxu1 %v1909_v61 }
  0x3c   : > { %1257 = vmatpush.bf16.msra.mxu3 %v1917_v60 }
  0x3e   : > { %1666 = vmatmul.msk.bf16.vlgmr.msrb.gmra.mxu1 %vm439_vm1, %v2203_v25  ;;  %1696 = vmatmul.msk.bf16.vlgmr.msrb.gmra.mxu2 %vm439_vm1, %v587_v31  ;;  %v834_v25 = vshrl.u32 %v2318_v26, 16  ;;  %v306_v31 = vld [vmem:[%s2163_s6 + $0xc] sm:$0xe] }
  0x40   : > { %v836_v43 = vor.u32 %v834_v25, %v832_v35  ;;  %v966_v35 = vunpack.c.l.b16 %v306_v31 }
  0x41   : > { %1727 = vmatmul.msk.bf16.gmra.mxu3 %vm439_vm1, %v2272_v59  ;;  %1757 = vmatmul.msk.bf16.gmra.mxu0 %vm439_vm1, %v833_v37  ;;  %v969_v37 = vrot.slane %v2272_v59, 1  ;;  %v971_v59 = vrot.slane %v2318_v26, 1 }
  0x42   : > { %v840_v49 = vsel %vm362_vm0, %v836_v43, %v839_v45  ;;  %v967_v32 = vpack.c.b16 %v1935_v44, %v966_v35 }
  0x43   : > { %v974_v61 = vsel %vm584_vm2, %v971_v59, %v973_v56 }
  0x44   : > { %v968_v20 = vrot.slane %v967_v32, 1 }
  0x46   : > { %v970_v25 = vsel %vm584_vm2, %v968_v20, %v969_v37  ;;  %v310_v20 = vld [vmem:[%s2163_s6 + $0x48] sm:$0x1] }
  0x4e   : > { %1667 = vmatmul.msk.bf16.gmra.mxu1 %vm439_vm1, %v2172_v6  ;;  %1697 = vmatmul.msk.bf16.gmra.mxu2 %vm439_vm1, %v589_v42  ;;  %v1922_v6 = vld [vmem:[%s2628_s1 + $0x108] sm:$0xff] }
  0x4f   : > { %1368 = vmatpush.bf16.msra.mxu0 %v1922_v6 }
  0x51   : > { %1728 = vmatmul.msk.bf16.gmra.mxu3 %vm439_vm1, %v2318_v26  ;;  %1758 = vmatmul.msk.bf16.gmra.mxu0 %vm439_vm1, %v840_v49 }
  0x53   : > { %1369 = vmatpush.bf16.msra.mxu0 %v1921_v9 }
  0x5e   : > { %1668 = vmatmul.msk.bf16.gmra.mxu1 %vm439_vm1, %v2175_v7  ;;  %1698 = vmatmul.msk.bf16.gmra.mxu2 %vm439_vm1, %v591_v54  ;;  %v2471_v54 = vld [vmem:[%s2163_s6 + $0x38] sm:$0xff]  }
  0x5f   : > { %v1199_v22 = vshrl.u32 %v2471_v54, 16 }
  0x61   : > { %1729 = vmatmul.msk.bf16.gmra.mxu3 %vm439_vm1, %v2335_v39  ;;  %1759 = vmatmul.msk.bf16.gmra.mxu0 %vm439_vm1, %v847_v58 }
  0x6e   : > { %1669 = vmatmul.msk.bf16.gmra.mxu1 %vm439_vm1, %v2178_v8  ;;  %1699 = vmatmul.msk.bf16.gmra.mxu2 %vm439_vm1, %v593_v2  ;;  %v1317_v2 = vrot.slane %v2471_v54, 1 }
  0x71   : > { %1730 = vmatmul.msk.bf16.gmra.mxu3 %vm439_vm1, %v2361_v50  ;;  %1760 = vmatmul.msk.bf16.gmra.mxu0 %vm439_vm1, %v854_v10 }
  0x7e   : > { %1670 = vmatmul.msk.bf16.gmra.mxu1 %vm439_vm1, %v2184_v12  ;;  %1700 = vmatmul.msk.bf16.gmra.mxu2 %vm439_vm1, %v595_v19 }
  0x81   : > { %1731 = vmatmul.msk.bf16.gmra.mxu3 %vm439_vm1, %v2384_v62  ;;  %1761 = vmatmul.msk.bf16.gmra.mxu0 %vm439_vm1, %v862_v23 }
  0x8e   : > { %1671 = vmatmul.msk.bf16.gmra.mxu1 %vm439_vm1, %v2188_v14  ;;  %1701 = vmatmul.msk.bf16.gmra.mxu2 %vm439_vm1, %v597_v30 }
  0x91   : > { %1850 = vmatmul.msk.bf16.vlgmr.msra.gmra.mxu3 %vm439_vm1, %v2227_v38  ;;  %1880 = vmatmul.msk.bf16.vlgmr.msra.gmra.mxu0 %vm439_vm1, %v1314_v36  ;;  %v2444_v38 = vld [vmem:[%s2163_s6 + $0x30] sm:$0xff]  }
  0x92   : > { %v1188_v43 = vshll.u32 %v2444_v38, 16  ;;  %v1315_v48 = vrot.slane %v2444_v38, 1 }
  0x94   : > { %v1190_v47 = vrot.slane %v1188_v43, 1  ;;  %v1316_v51 = vsel %vm584_vm2, %v594_v16, %v1315_v48  ;;  %v1318_v5 = vsel %vm584_vm2, %v1315_v48, %v1317_v2  ;;  %v2488_v16 = vld [vmem:[%s2163_s6 + $0x40] sm:$0xff]  ;;  %s2009_s6 = smul.u32 12, %s2644_s12 }
  0x95   : > { %v1202_v23 = vshll.u32 %v2488_v16, 16  ;;  %v1319_v32 = vrot.slane %v2488_v16, 1 }
  0x96   : > { %v1191_v26 = vsel %vm362_vm0, %v2220_v34, %v1190_v47  ;;  %v1195_v34 = vshll.u32 %v2471_v54, 16  ;;  %s284_s24 = sadd.s32 %s2010_s21, %s2009_s6 }
  0x97   : > { %v1204_v33 = vrot.slane %v1202_v23, 1  ;;  %v1320_v43 = vsel %vm584_vm2, %v1317_v2, %v1319_v32  ;;  %s1619_s25 = sshll.u32 %s284_s24, 2 }
  0x98   : > { %v1197_v0 = vrot.slane %v1195_v34, 1  ;;  %s2565_s26 = scalar_lea.vmem %s2630_s3, %s1619_s25 }
  0x9a   : > { %v1201_v31 = vor.u32 %v1199_v22, %v1197_v0 }
  0x9b   : > { %v2430_v40 = vpop.f32.mrf.mxu1 }
  0x9e   : > { %1786 = vmatmul.msk.bf16.vlgmr.msra.gmra.mxu1 %vm439_vm1, %v970_v25  ;;  %1820 = vmatmul.msk.bf16.vlgmr.msra.gmra.mxu2 %vm439_vm1, %v2178_v8  ;;  %v467_v41 = vpop.f32.mrf.mxu0  ;;  %v1205_v25 = vsel %vm362_vm0, %v1201_v31, %v1204_v33 }
  0xa1   : > { %v2436_v42 = vpop.f32.mrf.mxu2  ;;  %1851 = vmatmul.msk.bf16.gmra.mxu3 %vm439_vm1, %v2295_v11  ;;  %1881 = vmatmul.msk.bf16.gmra.mxu0 %vm439_vm1, %v595_v19  ;;  %v972_v11 = vsel %vm584_vm2, %v969_v37, %v971_v59 }
  0xa3   : > { %v2440_v7 = vpop.f32.mrf.mxu1 }
  0xa4   : > { %v2446_v44 = vpop.f32.mrf.mxu3 }
  0xa6   : > { %v469_v45 = vpop.f32.mrf.mxu0 }
  0xa9   : > { %v2450_v8 = vpop.f32.mrf.mxu2 }
  0xab   : > { %v2452_v46 = vpop.f32.mrf.mxu1 }
  0xac   : > { %v2456_v49 = vpop.f32.mrf.mxu3 }
  0xae   : > { %1787 = vmatmul.msk.bf16.gmra.mxu1 %vm439_vm1, %v972_v11  ;;  %1821 = vmatmul.msk.bf16.gmra.mxu2 %vm439_vm1, %v2184_v12  ;;  %v914_v6 = vpop.f32.mrf.mxu0  ;;  %v1192_v12 = vshrl.u32 %v2444_v38, 16 }
  0xb0   : > { %v1194_v63 = vor.u32 %v1192_v12, %v1190_v47 }
  0xb1   : > { %v2464_v52 = vpop.f32.mrf.mxu2  ;;  %1852 = vmatmul.msk.bf16.gmra.mxu3 %vm439_vm1, %v1191_v26  ;;  %1882 = vmatmul.msk.bf16.gmra.mxu0 %vm439_vm1, %v1316_v51  ;;  %v977_v51 = vrot.slane %v2384_v62, 1 }
  0xb2   : > { %v1198_v39 = vsel %vm362_vm0, %v1194_v63, %v1197_v0 }
  0xb3   : > { %v2467_v53 = vpop.f32.mrf.mxu1 }
  0xb4   : > { %v763_v55 = vpop.f32.mrf.mxu3 }
  0xb6   : > { %v916_v57 = vpop.f32.mrf.mxu0 }
  0xb9   : > { %v2476_v58 = vpop.f32.mrf.mxu2 }
  0xbb   : > { %v542_v60 = vpop.f32.mrf.mxu1 }
  0xbc   : > { %v543_v1 = vadd.f32 %v542_v60, %v467_v41  ;;  %v765_v3 = vpop.f32.mrf.mxu3  ;;  %v1186_v41 = vunpack.c.l.b16 %v310_v20 }
  0xbe   : > { %1788 = vmatmul.msk.bf16.gmra.mxu1 %vm439_vm1, %v974_v61  ;;  %1822 = vmatmul.msk.bf16.gmra.mxu2 %vm439_vm1, %v2188_v14  ;;  %v919_v4 = vpop.f32.mrf.mxu0  ;;  %v975_v14 = vrot.slane %v2361_v50, 1  ;;  %v1187_v47 = vpack.c.b16 %v1186_v41, %v1186_v41 }
  0xc0   : > { %v976_v30 = vsel %vm584_vm2, %v973_v56, %v975_v14  ;;  %v1210_v56 = vshll.u32 %v1187_v47, 16  ;;  %v978_v61 = vsel %vm584_vm2, %v975_v14, %v977_v51 }
  0xc1   : > { %v649_v9 = vpop.f32.mrf.mxu2  ;;  %1853 = vmatmul.msk.bf16.gmra.mxu3 %vm439_vm1, %v1198_v39  ;;  %1883 = vmatmul.msk.bf16.gmra.mxu0 %vm439_vm1, %v1318_v5 }
  0xc2   : > { %v679_v10 = vadd.f32 %v649_v9, %v543_v1  ;;  %v1212_v0 = vrot.slane %v1210_v56, 1 }
  0xc3   : > { %v544_v13 = vpop.f32.mrf.mxu1 }
  0xc4   : > { %v793_v17 = vadd.f32 %v763_v55, %v679_v10  ;;  %v545_v18 = vadd.f32 %v544_v13, %v469_v45  ;;  %v768_v19 = vpop.f32.mrf.mxu3  ;;  %v1206_v55 = vshrl.u32 %v2488_v16, 16 }
  0xc6   : > { %v2490_v21 = vadd.f32 %v914_v6, %v793_v17  ;;  %v921_v24 = vpop.f32.mrf.mxu0  ;;  %v1208_v63 = vor.u32 %v1206_v55, %v1204_v33 }
  0xc8   : > { %v1213_v39 = vsel %vm362_vm0, %v1208_v63, %v1212_v0 }
  0xc9   : > { %v651_v27 = vpop.f32.mrf.mxu2 }
  0xca   : > { %v680_v28 = vadd.f32 %v651_v27, %v545_v18 }
  0xcb   : > { %v547_v29 = vpop.f32.mrf.mxu1 }
  0xcc   : > { %v794_v35 = vadd.f32 %v765_v3, %v680_v28  ;;  %v548_v36 = vadd.f32 %v547_v29, %v2430_v40  ;;  %v770_v37 = vpop.f32.mrf.mxu3 }
  0xce   : > { %1789 = vmatmul.msk.bf16.gmra.mxu1 %vm439_vm1, %v976_v30  ;;  %1823 = vmatmul.msk.bf16.gmra.mxu2 %vm439_vm1, %v2444_v38  ;;  %v2502_v50 = vadd.f32 %v916_v57, %v794_v35  ;;  %v924_v59 = vpop.f32.mrf.mxu0 }
  0xd1   : > { %v654_v45 = vpop.f32.mrf.mxu2  ;;  %1854 = vmatmul.msk.bf16.gmra.mxu3 %vm439_vm1, %v1205_v25  ;;  %1884 = vmatmul.msk.bf16.gmra.mxu0 %vm439_vm1, %v1320_v43 }
  0xd2   : > { %v681_v11 = vadd.f32 %v654_v45, %v548_v36 }
  0xd3   : > { %v549_v40 = vpop.f32.mrf.mxu1 }
  0xd4   : > { %v795_v48 = vadd.f32 %v768_v19, %v681_v11  ;;  %v550_v26 = vadd.f32 %v549_v40, %v2440_v7  ;;  %v773_v38 = vpop.f32.mrf.mxu3  ;;  %v1321_v7 = vrot.slane %v1187_v47, 1 }
  0xd6   : > { %v2509_v6 = vadd.f32 %v919_v4, %v795_v48  ;;  %v926_v12 = vpop.f32.mrf.mxu0  ;;  %v1322_v5 = vsel %vm584_vm2, %v1319_v32, %v1321_v7 }
  0xd9   : > { %v656_v34 = vpop.f32.mrf.mxu2 }
  0xda   : > { %v682_v57 = vadd.f32 %v656_v34, %v550_v26 }
  0xdb   : > { %v552_v60 = vpop.f32.mrf.mxu1 }
  0xdc   : > { %v796_v1 = vadd.f32 %v770_v37, %v682_v57  ;;  %v553_v2 = vadd.f32 %v552_v60, %v2452_v46  ;;  %v775_v3 = vpop.f32.mrf.mxu3 }
  0xde   : > { %1790 = vmatmul.msk.bf16.gmra.mxu1 %vm439_vm1, %v978_v61  ;;  %1824 = vmatmul.msk.bf16.gmra.mxu2 %vm439_vm1, %v2471_v54  ;;  %v2518_v62 = vadd.f32 %v921_v24, %v796_v1  ;;  %v929_v4 = vpop.f32.mrf.mxu0  ;;  %v979_v54 = vrot.slane %v2401_v15, 1 }
  0xe0   : > { %v980_v27 = vsel %vm584_vm2, %v977_v51, %v979_v54 }
  0xe1   : > { %v659_v9 = vpop.f32.mrf.mxu2  ;;  %1855 = vmatmul.msk.bf16.gmra.mxu3 %vm439_vm1, %v1213_v39  ;;  %1885 = vmatmul.msk.bf16.gmra.mxu0 %vm439_vm1, %v1322_v5 }
  0xe2   : > { %v683_v10 = vadd.f32 %v659_v9, %v553_v2 }
  0xe3   : > { %v554_v13 = vpop.f32.mrf.mxu1 }
  0xe4   : > { %v797_v46 = vadd.f32 %v773_v38, %v683_v10  ;;  %v555_v17 = vadd.f32 %v554_v13, %v2467_v53  ;;  %v778_v18 = vpop.f32.mrf.mxu3 }
  0xe6   : > { %v2525_v19 = vadd.f32 %v924_v59, %v797_v46  ;;  %v931_v14 = vpop.f32.mrf.mxu0 }
  0xe9   : > { %v661_v22 = vpop.f32.mrf.mxu2 }
  0xea   : > { %v684_v23 = vadd.f32 %v661_v22, %v555_v17 }
  0xeb   : > { %v557_v24 = vpop.f32.mrf.mxu1 }
  0xec   : > { %v798_v28 = vadd.f32 %v775_v3, %v684_v23  ;;  %v780_v29 = vpop.f32.mrf.mxu3  ;;  %v558_v53 = vadd.f32 %v557_v24, %v2436_v42 }
  0xee   : > { %1791 = vmatmul.msk.bf16.gmra.mxu1 %vm439_vm1, %v980_v27  ;;  %1825 = vmatmul.msk.bf16.gmra.mxu2 %vm439_vm1, %v2488_v16  ;;  %v2532_v30 = vadd.f32 %v926_v12, %v798_v28  ;;  %v934_v31 = vpop.f32.mrf.mxu0 }
  0xf1   : > { %v664_v33 = vpop.f32.mrf.mxu2 }
  0xf2   : > { %v685_v15 = vadd.f32 %v664_v33, %v558_v53 }
  0xf3   : > { %v559_v35 = vpop.f32.mrf.mxu1 }
  0xf4   : > { %v799_v36 = vadd.f32 %v778_v18, %v685_v15  ;;  %v783_v32 = vpop.f32.mrf.mxu3  ;;  %v560_v37 = vadd.f32 %v559_v35, %v2450_v8 }
  0xf6   : > { %v2535_v20 = vadd.f32 %v929_v4, %v799_v36  ;;  %v936_v25 = vpop.f32.mrf.mxu0 }
  0xf9   : > { %v666_v41 = vpop.f32.mrf.mxu2 }
  0xfa   : > { %v686_v59 = vadd.f32 %v666_v41, %v560_v37 }
  0xfb   : > { %v562_v43 = vpop.f32.mrf.mxu1 }
  0xfc   : > { %v800_v45 = vadd.f32 %v780_v29, %v686_v59  ;;  %v785_v16 = vpop.f32.mrf.mxu3  ;;  %v563_v42 = vadd.f32 %v562_v43, %v2464_v52 }
  0xfe   : > { %v2538_v11 = vadd.f32 %v931_v14, %v800_v45  ;;  %v939_v40 = vpop.f32.mrf.mxu0 }
 0x101   : > { %v669_v47 = vpop.f32.mrf.mxu2 }
 0x102   : > { %v687_v48 = vadd.f32 %v669_v47, %v563_v42 }
 0x103   : > { %v564_v26 = vpop.f32.mrf.mxu1 }
 0x104   : > { %v801_v38 = vadd.f32 %v783_v32, %v687_v48  ;;  %v788_v51 = vpop.f32.mrf.mxu3  ;;  %v565_v8 = vadd.f32 %v564_v26, %v2476_v58 }
 0x106   : > { %v2541_v55 = vadd.f32 %v934_v31, %v801_v38  ;;  %v941_v56 = vpop.f32.mrf.mxu0 }
 0x109   : > { %v671_v12 = vpop.f32.mrf.mxu2 }
 0x10a   : > { %v688_v34 = vadd.f32 %v671_v12, %v565_v8 }
 0x10b   : > { %v567_v57 = vpop.f32.mrf.mxu1 }
 0x10c   : > { %v802_v60 = vadd.f32 %v785_v16, %v688_v34  ;;  %v790_v61 = vpop.f32.mrf.mxu3  ;;  %v568_v52 = vadd.f32 %v567_v57, %v2446_v44 }
 0x10e   : > { %v2544_v63 = vadd.f32 %v936_v25, %v802_v60  ;;  %v1371_v0 = vpop.f32.mrf.mxu0 }
 0x111   : > { %v674_v1 = vpop.f32.mrf.mxu2 }
 0x112   : > { %v689_v2 = vadd.f32 %v674_v1, %v568_v52 }
 0x113   : > { %v569_v7 = vpop.f32.mrf.mxu1 }
 0x114   : > { %v803_v3 = vadd.f32 %v788_v51, %v689_v2  ;;  %v1259_v39 = vpop.f32.mrf.mxu3  ;;  %v570_v58 = vadd.f32 %v569_v7, %v2456_v49  ;;  %v2558_v49 = vld [vmem:[%s2629_s2] ss:$0 sm:$0xff] }
 0x116   : > { %v2547_v4 = vadd.f32 %v939_v40, %v803_v3  ;;  %v1373_v9 = vpop.f32.mrf.mxu0 }
 0x119   : > { %v676_v5 = vpop.f32.mrf.mxu2 }
 0x11a   : > { %v690_v10 = vadd.f32 %v676_v5, %v570_v58 }
 0x11b   : > { %v1032_v13 = vpop.f32.mrf.mxu1 }
 0x11c   : > { %v804_v46 = vadd.f32 %v790_v61, %v690_v10  ;;  %v1261_v17 = vpop.f32.mrf.mxu3  ;;  %v1062_v44 = vadd.f32 %v1032_v13, %v2490_v21 }
 0x11e   : > { %v2550_v18 = vadd.f32 %v941_v56, %v804_v46  ;;  %v1376_v23 = vpop.f32.mrf.mxu0 }
 0x121   : > { %v1134_v54 = vpop.f32.mrf.mxu2 }
 0x122   : > { %v1164_v14 = vadd.f32 %v1134_v54, %v1062_v44 }
 0x123   : > { %v1034_v22 = vpop.f32.mrf.mxu1 }
 0x124   : > { %v1289_v24 = vadd.f32 %v1259_v39, %v1164_v14  ;;  %v1264_v27 = vpop.f32.mrf.mxu3  ;;  %v1063_v21 = vadd.f32 %v1034_v22, %v2502_v50 }
 0x126   : > { %v1401_v28 = vadd.f32 %v1371_v0, %v1289_v24  ;;  %v1378_v37 = vpop.f32.mrf.mxu0 }
 0x128   : > { %v1417_v29 = vadd.f32 %v2558_v49, %v1401_v28 }
 0x129   : > { %v1136_v53 = vpop.f32.mrf.mxu2 }
 0x12a   : > { %v1429_v31 = vmax.f32 %v1417_v29, 0.0  ;;  %v1165_v33 = vadd.f32 %v1136_v53, %v1063_v21 }
 0x12b   : > { %v1037_v15 = vpop.f32.mrf.mxu1 }
 0x12c   : > { %v1441_v35 = vpack.c.bf16 %v1429_v31, %v1429_v31  ;;  %v1290_v36 = vadd.f32 %v1261_v17, %v1165_v33  ;;  %v1266_v32 = vpop.f32.mrf.mxu3  ;;  %v1064_v41 = vadd.f32 %v1037_v15, %v2509_v6 }
 0x12e   : > { %1454 = vst.msk [vmem:[%s2565_s26] sm:$0xf] %vm1453_vm3, %v1441_v35  ;;  %v1402_v25 = vadd.f32 %v1373_v9, %v1290_v36  ;;  %v1381_v26 = vpop.f32.mrf.mxu0 }
 0x130   : > { %v1418_v50 = vadd.f32 %v2558_v49, %v1402_v25 }
 0x131   : > { %v1139_v59 = vpop.f32.mrf.mxu2 }
 0x132   : > { %v1430_v43 = vmax.f32 %v1418_v50, 0.0  ;;  %v1166_v45 = vadd.f32 %v1139_v59, %v1064_v41 }
 0x133   : > { %v1039_v16 = vpop.f32.mrf.mxu1 }
 0x134   : > { %v1442_v42 = vpack.c.bf16 %v1430_v43, %v1430_v43  ;;  %v1291_v40 = vadd.f32 %v1264_v27, %v1166_v45  ;;  %v1269_v47 = vpop.f32.mrf.mxu3  ;;  %v1065_v51 = vadd.f32 %v1039_v16, %v2518_v62 }
 0x136   : > { %1455 = vst.msk [vmem:[%s2565_s26 + $0x4] sm:$0xf] %vm1453_vm3, %v1442_v42  ;;  %v1403_v48 = vadd.f32 %v1376_v23, %v1291_v40  ;;  %v1383_v2 = vpop.f32.mrf.mxu0 }
 0x138   : > { %v1419_v38 = vadd.f32 %v2558_v49, %v1403_v48 }
 0x139   : > { %v1141_v8 = vpop.f32.mrf.mxu2 }
 0x13a   : > { %v1431_v56 = vmax.f32 %v1419_v38, 0.0  ;;  %v1167_v12 = vadd.f32 %v1141_v8, %v1065_v51 }
 0x13b   : > { %v1042_v6 = vpop.f32.mrf.mxu1 }
 0x13c   : > { %v1443_v34 = vpack.c.bf16 %v1431_v56, %v1431_v56  ;;  %v1292_v57 = vadd.f32 %v1266_v32, %v1167_v12  ;;  %v1271_v61 = vpop.f32.mrf.mxu3  ;;  %v1066_v0 = vadd.f32 %v1042_v6, %v2525_v19 }
 0x13e   : > { %1456 = vst.msk [vmem:[%s2565_s26 + $0x8] sm:$0xf] %vm1453_vm3, %v1443_v34  ;;  %v1404_v60 = vadd.f32 %v1378_v37, %v1292_v57  ;;  %v1386_v54 = vpop.f32.mrf.mxu0 }
 0x140   : > { %v1420_v52 = vadd.f32 %v2558_v49, %v1404_v60 }
 0x141   : > { %v1144_v1 = vpop.f32.mrf.mxu2 }
 0x142   : > { %v1432_v7 = vmax.f32 %v1420_v52, 0.0  ;;  %v1168_v3 = vadd.f32 %v1144_v1, %v1066_v0 }
 0x143   : > { %v1044_v62 = vpop.f32.mrf.mxu1 }
 0x144   : > { %v1444_v39 = vpack.c.bf16 %v1432_v7, %v1432_v7  ;;  %v1293_v58 = vadd.f32 %v1269_v47, %v1168_v3  ;;  %v1067_v10 = vadd.f32 %v1044_v62, %v2532_v30  ;;  %v1274_v46 = vpop.f32.mrf.mxu3 }
 0x146   : > { %1457 = vst.msk [vmem:[%s2565_s26 + $0xc] sm:$0xf] %vm1453_vm3, %v1444_v39  ;;  %v1405_v5 = vadd.f32 %v1381_v26, %v1293_v58  ;;  %v1388_v15 = vpop.f32.mrf.mxu0 }
 0x148   : > { %v1421_v9 = vadd.f32 %v2558_v49, %v1405_v5 }
 0x149   : > { %v1146_v13 = vpop.f32.mrf.mxu2 }
 0x14a   : > { %v1433_v17 = vmax.f32 %v1421_v9, 0.0  ;;  %v1169_v44 = vadd.f32 %v1146_v13, %v1067_v10 }
 0x14b   : > { %v1047_v19 = vpop.f32.mrf.mxu1 }
 0x14c   : > { %v1445_v14 = vpack.c.bf16 %v1433_v17, %v1433_v17  ;;  %v1294_v22 = vadd.f32 %v1271_v61, %v1169_v44  ;;  %v1068_v27 = vadd.f32 %v1047_v19, %v2535_v20  ;;  %v1276_v53 = vpop.f32.mrf.mxu3 }
 0x14e   : > { %1458 = vst.msk [vmem:[%s2565_s26 + $0x10] sm:$0xf] %vm1453_vm3, %v1445_v14  ;;  %v1406_v23 = vadd.f32 %v1383_v2, %v1294_v22  ;;  %v1391_v16 = vpop.f32.mrf.mxu0 }
 0x150   : > { %v1422_v24 = vadd.f32 %v2558_v49, %v1406_v23 }
 0x151   : > { %v1149_v28 = vpop.f32.mrf.mxu2 }
 0x152   : > { %v1434_v29 = vmax.f32 %v1422_v24, 0.0  ;;  %v1170_v21 = vadd.f32 %v1149_v28, %v1068_v27 }
 0x153   : > { %v1049_v30 = vpop.f32.mrf.mxu1 }
 0x154   : > { %v1446_v31 = vpack.c.bf16 %v1434_v29, %v1434_v29  ;;  %v1295_v33 = vadd.f32 %v1274_v46, %v1170_v21  ;;  %v1069_v32 = vadd.f32 %v1049_v30, %v2538_v11  ;;  %v1279_v43 = vpop.f32.mrf.mxu3 }
 0x156   : > { %1459 = vst.msk [vmem:[%s2565_s26 + $0x14] sm:$0xf] %vm1453_vm3, %v1446_v31  ;;  %v1407_v35 = vadd.f32 %v1386_v54, %v1295_v33  ;;  %v1393_v34 = vpop.f32.mrf.mxu0 }
 0x158   : > { %v1423_v36 = vadd.f32 %v2558_v49, %v1407_v35 }
 0x159   : > { %v1151_v37 = vpop.f32.mrf.mxu2 }
 0x15a   : > { %v1435_v25 = vmax.f32 %v1423_v36, 0.0  ;;  %v1171_v50 = vadd.f32 %v1151_v37, %v1069_v32 }
 0x15b   : > { %v1052_v20 = vpop.f32.mrf.mxu1 }
 0x15c   : > { %v1447_v41 = vpack.c.bf16 %v1435_v25, %v1435_v25  ;;  %v1296_v59 = vadd.f32 %v1276_v53, %v1171_v50  ;;  %v1070_v40 = vadd.f32 %v1052_v20, %v2541_v55  ;;  %v1281_v56 = vpop.f32.mrf.mxu3 }
 0x15e   : > { %1460 = vst.msk [vmem:[%s2565_s26 + $0x18] sm:$0xf] %vm1453_vm3, %v1447_v41  ;;  %v1408_v45 = vadd.f32 %v1388_v15, %v1296_v59 }
 0x160   : > { %v1424_v42 = vadd.f32 %v2558_v49, %v1408_v45 }
 0x161   : > { %v1154_v47 = vpop.f32.mrf.mxu2 }
 0x162   : > { %v1436_v48 = vmax.f32 %v1424_v42, 0.0  ;;  %v1172_v26 = vadd.f32 %v1154_v47, %v1070_v40 }
 0x163   : > { %v1054_v11 = vpop.f32.mrf.mxu1 }
 0x164   : > { %v1448_v38 = vpack.c.bf16 %v1436_v48, %v1436_v48  ;;  %v1297_v51 = vadd.f32 %v1279_v43, %v1172_v26  ;;  %v1071_v6 = vadd.f32 %v1054_v11, %v2544_v63  ;;  %v1284_v3 = vpop.f32.mrf.mxu3  ;;  %v1396_v63 = vpop.f32.mrf.mxu0 }
 0x166   : > { %1461 = vst.msk [vmem:[%s2565_s26 + $0x1c] sm:$0xf] %vm1453_vm3, %v1448_v38  ;;  %v1409_v8 = vadd.f32 %v1391_v16, %v1297_v51 }
 0x168   : > { %v1425_v12 = vadd.f32 %v2558_v49, %v1409_v8 }
 0x169   : > { %v1156_v57 = vpop.f32.mrf.mxu2 }
 0x16a   : > { %v1437_v60 = vmax.f32 %v1425_v12, 0.0  ;;  %v1173_v61 = vadd.f32 %v1156_v57, %v1071_v6 }
 0x16b   : > { %v1057_v55 = vpop.f32.mrf.mxu1 }
 0x16c   : > { %v1449_v52 = vpack.c.bf16 %v1437_v60, %v1437_v60  ;;  %v1298_v0 = vadd.f32 %v1281_v56, %v1173_v61  ;;  %v1072_v7 = vadd.f32 %v1057_v55, %v2547_v4  ;;  %v1286_v54 = vpop.f32.mrf.mxu3  ;;  %v1398_v23 = vpop.f32.mrf.mxu0 }
 0x16e   : > { %1462 = vst.msk [vmem:[%s2565_s26 + $0x20] sm:$0xf] %vm1453_vm3, %v1449_v52  ;;  %v1410_v1 = vadd.f32 %v1393_v34, %v1298_v0 }
 0x170   : > { %v1426_v2 = vadd.f32 %v2558_v49, %v1410_v1 }
 0x171   : > { %v1159_v62 = vpop.f32.mrf.mxu2 }
 0x172   : > { %v1438_v39 = vmax.f32 %v1426_v2, 0.0  ;;  %v1174_v58 = vadd.f32 %v1159_v62, %v1072_v7 }
 0x173   : > { %v1059_v10 = vpop.f32.mrf.mxu1 }
 0x174   : > { %v1450_v5 = vpack.c.bf16 %v1438_v39, %v1438_v39  ;;  %v1299_v9 = vadd.f32 %v1284_v3, %v1174_v58  ;;  %v1073_v17 = vadd.f32 %v1059_v10, %v2550_v18 }
 0x176   : > { %1463 = vst.msk [vmem:[%s2565_s26 + $0x24] sm:$0xf] %vm1453_vm3, %v1450_v5  ;;  %v1411_v13 = vadd.f32 %v1396_v63, %v1299_v9 }
 0x178   : > { %v1427_v46 = vadd.f32 %v2558_v49, %v1411_v13 }
 0x179   : > { %v1161_v44 = vpop.f32.mrf.mxu2 }
 0x17a   : > { %v1439_v19 = vmax.f32 %v1427_v46, 0.0  ;;  %v1175_v4 = vadd.f32 %v1161_v44, %v1073_v17 }
 0x17c   : > { %v1451_v14 = vpack.c.bf16 %v1439_v19, %v1439_v19  ;;  %v1300_v22 = vadd.f32 %v1286_v54, %v1175_v4 }
 0x17e   : > { %1464 = vst.msk [vmem:[%s2565_s26 + $0x28] sm:$0xf] %vm1453_vm3, %v1451_v14  ;;  %v1412_v24 = vadd.f32 %v1398_v23, %v1300_v22 }
 0x180   : > { %v1428_v27 = vadd.f32 %v2558_v49, %v1412_v24 }
 0x182   : > { %v1440_v28 = vmax.f32 %v1428_v27, 0.0 }
 0x184   : > { %v1452_v29 = vpack.c.bf16 %v1440_v28, %v1440_v28 }
 0x186   : > { %1465 = vst.msk [vmem:[%s2565_s26 + $0x2c] sm:$0xf] %vm1453_vm3, %v1452_v29 }
 0x187 PF: > { %s13_s16 = sadd.s32 1, %s2090_s16   ;;  %s2631_s12 = smov %s2082_s14 }
 0x188   : > { %p10_p7 = scmp.ge.s32.totalorder %s13_s16, 10   ;;  %s2632_s13 = smov %s2086_s15 }
 0x189   : > { %s2633_s14 = smov %s2636_s17  ;;  %s2634_s15 = smov %s2640_s18 }
 0x18a   :  { %12 = sbr.rel (!%p10_p7) target bundleno = 3 (0x3), region = 76 }

</bundles_post_ra>
